<compile_context>
chip_gen: v7x
topology: tpu7x:2x2x1
jax: 0.10.0
libtpu: 0.0.40
codegen_flags: <defaults>
</compile_context>

<pallas_src>
import jax
import jax.numpy as jnp
from jax.experimental import pallas as pl
from jax.experimental.pallas import tpu as pltpu


def _kernel_roll(col_ref, out_ref):
    """Fast path: rolls on the XLU (requires h1 % 8 == 0 and w1 % 128 == 0)."""
    c0 = col_ref[0, 0]          # (TB, h1, w1) window tap (y=0, x=0)
    c1 = col_ref[0, 1]          # (y=0, x=1)
    c2 = col_ref[0, 2]          # (y=1, x=0)
    c3 = col_ref[0, 3]          # (y=1, x=1)
    h1, w1 = c0.shape[1], c0.shape[2]

    # x1 = U1ImulP1I @ col, expanded elementwise (VPU).
    t0 = 0.5 * (-c0 - c1 - c2 + c3)
    t1 = 0.5 * ( c0 - c1 + c2 + c3)
    t2 = 0.5 * ( c0 + c1 - c2 + c3)
    t3 = 0.5 * ( c0 - c1 - c2 - c3)

    # torch.roll(shift=-1) == circular roll by (size - 1); XLU slot, ~free.
    t1 = pltpu.roll(t1, shift=h1 - 1, axis=1)
    t2 = pltpu.roll(t2, shift=w1 - 1, axis=2)
    t3 = pltpu.roll(pltpu.roll(t3, shift=h1 - 1, axis=1), shift=w1 - 1, axis=2)

    # x2 = U2ImulP2Imul4 @ x1_rolled.
    out_ref[0, 0] = -t0 + t1 + t2 - t3   # A_low0
    out_ref[0, 1] = -t0 - t1 - t2 - t3   # B_high1
    out_ref[0, 2] = -t0 - t1 + t2 + t3   # C_high2
    out_ref[0, 3] =  t0 - t1 + t2 - t3   # D_high3


def _kernel_matmul(col_ref, qh_ref, pw_ref, out_ref):
    """Fallback for unaligned (h1, w1): rolls as exact tiny permutation matmuls."""
    qh = qh_ref[...]            # (h1, h1): left-mult == roll(-1) over rows
    pw = pw_ref[...]            # (w1, w1): right-mult == roll(-1) over cols
    tb = col_ref.shape[2]
    for bi in range(tb):                      # static unroll over channels in block
        c0 = col_ref[0, 0, bi]                # (h1, w1)
        c1 = col_ref[0, 1, bi]
        c2 = col_ref[0, 2, bi]
        c3 = col_ref[0, 3, bi]
        t0 = 0.5 * (-c0 - c1 - c2 + c3)
        t1 = 0.5 * ( c0 - c1 + c2 + c3)
        t2 = 0.5 * ( c0 + c1 - c2 + c3)
        t3 = 0.5 * ( c0 - c1 - c2 - c3)
        t1 = jnp.dot(qh, t1, preferred_element_type=jnp.float32)
        t2 = jnp.dot(t2, pw, preferred_element_type=jnp.float32)
        t3 = jnp.dot(qh, jnp.dot(t3, pw, preferred_element_type=jnp.float32),
                     preferred_element_type=jnp.float32)
        out_ref[0, 0, bi] = -t0 + t1 + t2 - t3
        out_ref[0, 1, bi] = -t0 - t1 - t2 - t3
        out_ref[0, 2, bi] = -t0 - t1 + t2 + t3
        out_ref[0, 3, bi] =  t0 - t1 + t2 - t3


def nlwt_catone(x, *, target_block_bytes=2 << 20):
    """Forward pass of the PyTorch nlwt_catone module.

    x: (b, c, h, w) float32 (NCHW).  Returns (out_catone, orisize) with
    out_catone of shape (b, 4*c, h//2, w//2) and orisize == x.shape.
    """
    b, c, h, w = x.shape
    if h % 2 or w % 2:
        raise ValueError(f"nlwt_catone requires even spatial dims, got {(h, w)}")
    h1, w1 = h // 2, w // 2
    x = x.astype(jnp.float32)

    # Polyphase split (== im2col(2,2,stride=2,pad=0)), band-major layout:
    # (b, c, h, w) -> (b, 4, c, h1, w1), tap index k = 2*y + x.  Single XLA copy.
    xr = x.reshape(b, c, h1, 2, w1, 2)
    cols = xr.transpose(0, 3, 5, 1, 2, 4).reshape(b, 4, c, h1, w1)

    # Mosaic's XLU rotate needs the minor dims tile-aligned; otherwise use the
    # (exact) permutation-matmul fallback.
    use_roll = (h1 % 8 == 0) and (w1 % 128 == 0)

    # Channels per grid step: aim for ~2 MiB input blocks (large DMAs), <= c.
    bytes_per_channel = 4 * h1 * w1 * 4          # 4 taps * f32
    tb = max(1, min(c, target_block_bytes // bytes_per_channel))
    if not use_roll:
        # The fallback statically unrolls over channels in the block; cap the
        # unroll so code size / compile time stay bounded for tiny-spatial,
        # many-channel inputs.  (Test shape: c=4 -> tb=4, unchanged.)
        tb = min(tb, 32)
    c_tiles = pl.cdiv(c, tb)

    block = (1, 4, tb, h1, w1)
    data_spec = pl.BlockSpec(block, lambda ib, ic: (ib, 0, ic, 0, 0))

    if use_roll:
        kernel = _kernel_roll
        in_specs = [data_spec]
        args = (cols,)
    else:
        # Permutation matrices realizing torch.roll(shift=-1) exactly.
        qh = ((jnp.arange(h1)[:, None] + 1) % h1 ==
              jnp.arange(h1)[None, :]).astype(jnp.float32)
        pw = (jnp.arange(w1)[:, None] ==
              (jnp.arange(w1)[None, :] + 1) % w1).astype(jnp.float32)
        kernel = _kernel_matmul
        in_specs = [data_spec,
                    pl.BlockSpec((h1, h1), lambda ib, ic: (0, 0)),
                    pl.BlockSpec((w1, w1), lambda ib, ic: (0, 0))]
        args = (cols, qh, pw)

    out = pl.pallas_call(
        kernel,
        out_shape=jax.ShapeDtypeStruct((b, 4, c, h1, w1), jnp.float32),
        grid=(b, c_tiles),
        in_specs=in_specs,
        out_specs=pl.BlockSpec(block, lambda ib, ic: (ib, 0, ic, 0, 0)),
        compiler_params=pltpu.CompilerParams(
            dimension_semantics=("parallel", "parallel"),
            vmem_limit_bytes=32 * 1024 * 1024),
    )(*args)

    # (b, 4, c, h1, w1) -> (b, 4*c, h1, w1): a free view; channel order is
    # [A_0..A_{c-1}, B_0.., C_0.., D_0..] == torch.cat([A, B, C, D], dim=1).
    out_catone = out.reshape(b, 4 * c, h1, w1)
    orisize = (b, c, h, w)  # analogue of torch.Size
    return out_catone, orisize


def _nlwt_catone_ref(x):
    """Pure-JAX reference mirroring the PyTorch code exactly."""
    b, c, h, w = x.shape
    h1, w1 = h // 2, w // 2
    xr = x.reshape(b, c, h1, 2, w1, 2)
    c0 = xr[:, :, :, 0, :, 0]
    c1 = xr[:, :, :, 0, :, 1]
    c2 = xr[:, :, :, 1, :, 0]
    c3 = xr[:, :, :, 1, :, 1]
    t0 = 0.5 * (-c0 - c1 - c2 + c3)
    t1 = 0.5 * ( c0 - c1 + c2 + c3)
    t2 = 0.5 * ( c0 + c1 - c2 + c3)
    t3 = 0.5 * ( c0 - c1 - c2 - c3)
    t1 = jnp.roll(t1, -1, axis=2)
    t2 = jnp.roll(t2, -1, axis=3)
    t3 = jnp.roll(t3, (-1, -1), axis=(2, 3))
    A = -t0 + t1 + t2 - t3
    B = -t0 - t1 - t2 - t3
    C = -t0 - t1 + t2 + t3
    D =  t0 - t1 + t2 - t3
    return jnp.concatenate([A, B, C, D], axis=1)


if __name__ == "__main__":
    key = jax.random.PRNGKey(0)
    x = jax.random.normal(key, (2, 4, 16, 16), dtype=jnp.float32)

    out, orisize = jax.jit(nlwt_catone)(x)
    out = jax.block_until_ready(out)

    assert out.shape == (2, 16, 8, 8), out.shape
    assert orisize == (2, 4, 16, 16)

    ref = _nlwt_catone_ref(x)
    assert jnp.allclose(out, ref, atol=1e-5, rtol=1e-5)

    print("KERNEL_OK")
</pallas_src>

<mosaic_0001>
module attributes {stable_mosaic.version = 11 : i64} {
  func.func @_kernel_matmul(%arg0: i32, %arg1: i32, %arg2: memref<1x4x4x8x8xf32, #tpu.memory_space<vmem>>, %arg3: memref<8x8xf32, #tpu.memory_space<vmem>>, %arg4: memref<8x8xf32, #tpu.memory_space<vmem>>, %arg5: memref<1x4x4x8x8xf32, #tpu.memory_space<vmem>>) attributes {dimension_semantics = [#tpu.dimension_semantics<parallel>, #tpu.dimension_semantics<parallel>], iteration_bounds = array<i64: 2, 1>, scalar_prefetch = 0 : i64, scratch_operands = 0 : i64, tpu.core_type = #tpu.core_type<tc>, window_params = [{transform_indices = @transform_0, window_bounds = array<i64: 1, 4, 4, 8, 8>}, {pipeline_mode = #tpu.pipeline_mode<synchronous>, transform_indices = @transform_1, window_bounds = array<i64: 8, 8>}, {pipeline_mode = #tpu.pipeline_mode<synchronous>, transform_indices = @transform_2, window_bounds = array<i64: 8, 8>}, {transform_indices = @transform_3, window_bounds = array<i64: 1, 4, 4, 8, 8>}]} {
    %c0 = arith.constant 0 : index
    %c0_0 = arith.constant 0 : index
    %0 = vector.load %arg3[%c0, %c0_0] : memref<8x8xf32, #tpu.memory_space<vmem>>, vector<8x8xf32>
    %c0_1 = arith.constant 0 : index
    %c0_2 = arith.constant 0 : index
    %1 = vector.load %arg4[%c0_1, %c0_2] : memref<8x8xf32, #tpu.memory_space<vmem>>, vector<8x8xf32>
    %c0_3 = arith.constant 0 : index
    %c0_4 = arith.constant 0 : index
    %c0_5 = arith.constant 0 : index
    %c0_6 = arith.constant 0 : index
    %c0_7 = arith.constant 0 : index
    %2 = vector.load %arg2[%c0_3, %c0_4, %c0_5, %c0_6, %c0_7] : memref<1x4x4x8x8xf32, #tpu.memory_space<vmem>>, vector<1x1x1x8x8xf32>
    %3 = vector.shape_cast %2 : vector<1x1x1x8x8xf32> to vector<8x8xf32>
    %c0_8 = arith.constant 0 : index
    %c1 = arith.constant 1 : index
    %c0_9 = arith.constant 0 : index
    %c0_10 = arith.constant 0 : index
    %c0_11 = arith.constant 0 : index
    %4 = vector.load %arg2[%c0_8, %c1, %c0_9, %c0_10, %c0_11] : memref<1x4x4x8x8xf32, #tpu.memory_space<vmem>>, vector<1x1x1x8x8xf32>
    %5 = vector.shape_cast %4 : vector<1x1x1x8x8xf32> to vector<8x8xf32>
    %c0_12 = arith.constant 0 : index
    %c2 = arith.constant 2 : index
    %c0_13 = arith.constant 0 : index
    %c0_14 = arith.constant 0 : index
    %c0_15 = arith.constant 0 : index
    %6 = vector.load %arg2[%c0_12, %c2, %c0_13, %c0_14, %c0_15] : memref<1x4x4x8x8xf32, #tpu.memory_space<vmem>>, vector<1x1x1x8x8xf32>
    %7 = vector.shape_cast %6 : vector<1x1x1x8x8xf32> to vector<8x8xf32>
    %c0_16 = arith.constant 0 : index
    %c3 = arith.constant 3 : index
    %c0_17 = arith.constant 0 : index
    %c0_18 = arith.constant 0 : index
    %c0_19 = arith.constant 0 : index
    %8 = vector.load %arg2[%c0_16, %c3, %c0_17, %c0_18, %c0_19] : memref<1x4x4x8x8xf32, #tpu.memory_space<vmem>>, vector<1x1x1x8x8xf32>
    %9 = vector.shape_cast %8 : vector<1x1x1x8x8xf32> to vector<8x8xf32>
    %cst = arith.constant 0.000000e+00 : f32
    %10 = vector.broadcast %cst : f32 to vector<8x8xf32>
    %11 = arith.subf %10, %3 : vector<8x8xf32>
    %12 = arith.subf %11, %5 : vector<8x8xf32>
    %13 = arith.subf %12, %7 : vector<8x8xf32>
    %14 = arith.addf %13, %9 : vector<8x8xf32>
    %cst_20 = arith.constant 5.000000e-01 : f32
    %15 = vector.broadcast %cst_20 : f32 to vector<8x8xf32>
    %16 = arith.mulf %15, %14 : vector<8x8xf32>
    %17 = arith.subf %3, %5 : vector<8x8xf32>
    %18 = arith.addf %17, %7 : vector<8x8xf32>
    %19 = arith.addf %18, %9 : vector<8x8xf32>
    %cst_21 = arith.constant 5.000000e-01 : f32
    %20 = vector.broadcast %cst_21 : f32 to vector<8x8xf32>
    %21 = arith.mulf %20, %19 : vector<8x8xf32>
    %22 = arith.addf %3, %5 : vector<8x8xf32>
    %23 = arith.subf %22, %7 : vector<8x8xf32>
    %24 = arith.addf %23, %9 : vector<8x8xf32>
    %cst_22 = arith.constant 5.000000e-01 : f32
    %25 = vector.broadcast %cst_22 : f32 to vector<8x8xf32>
    %26 = arith.mulf %25, %24 : vector<8x8xf32>
    %27 = arith.subf %3, %5 : vector<8x8xf32>
    %28 = arith.subf %27, %7 : vector<8x8xf32>
    %29 = arith.subf %28, %9 : vector<8x8xf32>
    %cst_23 = arith.constant 5.000000e-01 : f32
    %30 = vector.broadcast %cst_23 : f32 to vector<8x8xf32>
    %31 = arith.mulf %30, %29 : vector<8x8xf32>
    %cst_24 = arith.constant dense<0.000000e+00> : vector<8x8xf32>
    %32 = tpu.matmul %0, %21, %cst_24 {dimension_numbers = #tpu.dot_dimension_numbers<[1], [0], [0], [1], [0, 0, 1, 1], [], []>} : vector<8x8xf32>, vector<8x8xf32>, vector<8x8xf32> -> vector<8x8xf32>
    %cst_25 = arith.constant dense<0.000000e+00> : vector<8x8xf32>
    %33 = tpu.matmul %26, %1, %cst_25 {dimension_numbers = #tpu.dot_dimension_numbers<[1], [0], [0], [1], [0, 0, 1, 1], [], []>} : vector<8x8xf32>, vector<8x8xf32>, vector<8x8xf32> -> vector<8x8xf32>
    %cst_26 = arith.constant dense<0.000000e+00> : vector<8x8xf32>
    %34 = tpu.matmul %31, %1, %cst_26 {dimension_numbers = #tpu.dot_dimension_numbers<[1], [0], [0], [1], [0, 0, 1, 1], [], []>} : vector<8x8xf32>, vector<8x8xf32>, vector<8x8xf32> -> vector<8x8xf32>
    %cst_27 = arith.constant dense<0.000000e+00> : vector<8x8xf32>
    %35 = tpu.matmul %0, %34, %cst_27 {dimension_numbers = #tpu.dot_dimension_numbers<[1], [0], [0], [1], [0, 0, 1, 1], [], []>} : vector<8x8xf32>, vector<8x8xf32>, vector<8x8xf32> -> vector<8x8xf32>
    %cst_28 = arith.constant 0.000000e+00 : f32
    %36 = vector.broadcast %cst_28 : f32 to vector<8x8xf32>
    %37 = arith.subf %36, %16 : vector<8x8xf32>
    %38 = arith.addf %37, %32 : vector<8x8xf32>
    %39 = arith.addf %38, %33 : vector<8x8xf32>
    %40 = arith.subf %39, %35 : vector<8x8xf32>
    %c0_29 = arith.constant 0 : index
    %c0_30 = arith.constant 0 : index
    %c0_31 = arith.constant 0 : index
    %c0_32 = arith.constant 0 : index
    %c0_33 = arith.constant 0 : index
    %41 = vector.load %arg5[%c0_29, %c0_30, %c0_31, %c0_32, %c0_33] : memref<1x4x4x8x8xf32, #tpu.memory_space<vmem>>, vector<1x1x1x8x8xf32>
    %42 = vector.shape_cast %41 : vector<1x1x1x8x8xf32> to vector<8x8xf32>
    %43 = vector.shape_cast %40 : vector<8x8xf32> to vector<1x1x1x8x8xf32>
    tpu.vector_store %arg5[%c0_29, %c0_30, %c0_31, %c0_32, %c0_33], %43 {strides = array<i32>} : memref<1x4x4x8x8xf32, #tpu.memory_space<vmem>>, vector<1x1x1x8x8xf32>,
    %cst_34 = arith.constant 0.000000e+00 : f32
    %44 = vector.broadcast %cst_34 : f32 to vector<8x8xf32>
    %45 = arith.subf %44, %16 : vector<8x8xf32>
    %46 = arith.subf %45, %32 : vector<8x8xf32>
    %47 = arith.subf %46, %33 : vector<8x8xf32>
    %48 = arith.subf %47, %35 : vector<8x8xf32>
    %c0_35 = arith.constant 0 : index
    %c1_36 = arith.constant 1 : index
    %c0_37 = arith.constant 0 : index
    %c0_38 = arith.constant 0 : index
    %c0_39 = arith.constant 0 : index
    %49 = vector.load %arg5[%c0_35, %c1_36, %c0_37, %c0_38, %c0_39] : memref<1x4x4x8x8xf32, #tpu.memory_space<vmem>>, vector<1x1x1x8x8xf32>
    %50 = vector.shape_cast %49 : vector<1x1x1x8x8xf32> to vector<8x8xf32>
    %51 = vector.shape_cast %48 : vector<8x8xf32> to vector<1x1x1x8x8xf32>
    tpu.vector_store %arg5[%c0_35, %c1_36, %c0_37, %c0_38, %c0_39], %51 {strides = array<i32>} : memref<1x4x4x8x8xf32, #tpu.memory_space<vmem>>, vector<1x1x1x8x8xf32>,
    %cst_40 = arith.constant 0.000000e+00 : f32
    %52 = vector.broadcast %cst_40 : f32 to vector<8x8xf32>
    %53 = arith.subf %52, %16 : vector<8x8xf32>
    %54 = arith.subf %53, %32 : vector<8x8xf32>
    %55 = arith.addf %54, %33 : vector<8x8xf32>
    %56 = arith.addf %55, %35 : vector<8x8xf32>
    %c0_41 = arith.constant 0 : index
    %c2_42 = arith.constant 2 : index
    %c0_43 = arith.constant 0 : index
    %c0_44 = arith.constant 0 : index
    %c0_45 = arith.constant 0 : index
    %57 = vector.load %arg5[%c0_41, %c2_42, %c0_43, %c0_44, %c0_45] : memref<1x4x4x8x8xf32, #tpu.memory_space<vmem>>, vector<1x1x1x8x8xf32>
    %58 = vector.shape_cast %57 : vector<1x1x1x8x8xf32> to vector<8x8xf32>
    %59 = vector.shape_cast %56 : vector<8x8xf32> to vector<1x1x1x8x8xf32>
    tpu.vector_store %arg5[%c0_41, %c2_42, %c0_43, %c0_44, %c0_45], %59 {strides = array<i32>} : memref<1x4x4x8x8xf32, #tpu.memory_space<vmem>>, vector<1x1x1x8x8xf32>,
    %60 = arith.subf %16, %32 : vector<8x8xf32>
    %61 = arith.addf %60, %33 : vector<8x8xf32>
    %62 = arith.subf %61, %35 : vector<8x8xf32>
    %c0_46 = arith.constant 0 : index
    %c3_47 = arith.constant 3 : index
    %c0_48 = arith.constant 0 : index
    %c0_49 = arith.constant 0 : index
    %c0_50 = arith.constant 0 : index
    %63 = vector.load %arg5[%c0_46, %c3_47, %c0_48, %c0_49, %c0_50] : memref<1x4x4x8x8xf32, #tpu.memory_space<vmem>>, vector<1x1x1x8x8xf32>
    %64 = vector.shape_cast %63 : vector<1x1x1x8x8xf32> to vector<8x8xf32>
    %65 = vector.shape_cast %62 : vector<8x8xf32> to vector<1x1x1x8x8xf32>
    tpu.vector_store %arg5[%c0_46, %c3_47, %c0_48, %c0_49, %c0_50], %65 {strides = array<i32>} : memref<1x4x4x8x8xf32, #tpu.memory_space<vmem>>, vector<1x1x1x8x8xf32>,
    %c0_51 = arith.constant 0 : index
    %c0_52 = arith.constant 0 : index
    %c1_53 = arith.constant 1 : index
    %c0_54 = arith.constant 0 : index
    %c0_55 = arith.constant 0 : index
    %66 = vector.load %arg2[%c0_51, %c0_52, %c1_53, %c0_54, %c0_55] : memref<1x4x4x8x8xf32, #tpu.memory_space<vmem>>, vector<1x1x1x8x8xf32>
    %67 = vector.shape_cast %66 : vector<1x1x1x8x8xf32> to vector<8x8xf32>
    %c0_56 = arith.constant 0 : index
    %c1_57 = arith.constant 1 : index
    %c1_58 = arith.constant 1 : index
    %c0_59 = arith.constant 0 : index
    %c0_60 = arith.constant 0 : index
    %68 = vector.load %arg2[%c0_56, %c1_57, %c1_58, %c0_59, %c0_60] : memref<1x4x4x8x8xf32, #tpu.memory_space<vmem>>, vector<1x1x1x8x8xf32>
    %69 = vector.shape_cast %68 : vector<1x1x1x8x8xf32> to vector<8x8xf32>
    %c0_61 = arith.constant 0 : index
    %c2_62 = arith.constant 2 : index
    %c1_63 = arith.constant 1 : index
    %c0_64 = arith.constant 0 : index
    %c0_65 = arith.constant 0 : index
    %70 = vector.load %arg2[%c0_61, %c2_62, %c1_63, %c0_64, %c0_65] : memref<1x4x4x8x8xf32, #tpu.memory_space<vmem>>, vector<1x1x1x8x8xf32>
    %71 = vector.shape_cast %70 : vector<1x1x1x8x8xf32> to vector<8x8xf32>
    %c0_66 = arith.constant 0 : index
    %c3_67 = arith.constant 3 : index
    %c1_68 = arith.constant 1 : index
    %c0_69 = arith.constant 0 : index
    %c0_70 = arith.constant 0 : index
    %72 = vector.load %arg2[%c0_66, %c3_67, %c1_68, %c0_69, %c0_70] : memref<1x4x4x8x8xf32, #tpu.memory_space<vmem>>, vector<1x1x1x8x8xf32>
    %73 = vector.shape_cast %72 : vector<1x1x1x8x8xf32> to vector<8x8xf32>
    %cst_71 = arith.constant 0.000000e+00 : f32
    %74 = vector.broadcast %cst_71 : f32 to vector<8x8xf32>
    %75 = arith.subf %74, %67 : vector<8x8xf32>
    %76 = arith.subf %75, %69 : vector<8x8xf32>
    %77 = arith.subf %76, %71 : vector<8x8xf32>
    %78 = arith.addf %77, %73 : vector<8x8xf32>
    %cst_72 = arith.constant 5.000000e-01 : f32
    %79 = vector.broadcast %cst_72 : f32 to vector<8x8xf32>
    %80 = arith.mulf %79, %78 : vector<8x8xf32>
    %81 = arith.subf %67, %69 : vector<8x8xf32>
    %82 = arith.addf %81, %71 : vector<8x8xf32>
    %83 = arith.addf %82, %73 : vector<8x8xf32>
    %cst_73 = arith.constant 5.000000e-01 : f32
    %84 = vector.broadcast %cst_73 : f32 to vector<8x8xf32>
    %85 = arith.mulf %84, %83 : vector<8x8xf32>
    %86 = arith.addf %67, %69 : vector<8x8xf32>
    %87 = arith.subf %86, %71 : vector<8x8xf32>
    %88 = arith.addf %87, %73 : vector<8x8xf32>
    %cst_74 = arith.constant 5.000000e-01 : f32
    %89 = vector.broadcast %cst_74 : f32 to vector<8x8xf32>
    %90 = arith.mulf %89, %88 : vector<8x8xf32>
    %91 = arith.subf %67, %69 : vector<8x8xf32>
    %92 = arith.subf %91, %71 : vector<8x8xf32>
    %93 = arith.subf %92, %73 : vector<8x8xf32>
    %cst_75 = arith.constant 5.000000e-01 : f32
    %94 = vector.broadcast %cst_75 : f32 to vector<8x8xf32>
    %95 = arith.mulf %94, %93 : vector<8x8xf32>
    %cst_76 = arith.constant dense<0.000000e+00> : vector<8x8xf32>
    %96 = tpu.matmul %0, %85, %cst_76 {dimension_numbers = #tpu.dot_dimension_numbers<[1], [0], [0], [1], [0, 0, 1, 1], [], []>} : vector<8x8xf32>, vector<8x8xf32>, vector<8x8xf32> -> vector<8x8xf32>
    %cst_77 = arith.constant dense<0.000000e+00> : vector<8x8xf32>
    %97 = tpu.matmul %90, %1, %cst_77 {dimension_numbers = #tpu.dot_dimension_numbers<[1], [0], [0], [1], [0, 0, 1, 1], [], []>} : vector<8x8xf32>, vector<8x8xf32>, vector<8x8xf32> -> vector<8x8xf32>
    %cst_78 = arith.constant dense<0.000000e+00> : vector<8x8xf32>
    %98 = tpu.matmul %95, %1, %cst_78 {dimension_numbers = #tpu.dot_dimension_numbers<[1], [0], [0], [1], [0, 0, 1, 1], [], []>} : vector<8x8xf32>, vector<8x8xf32>, vector<8x8xf32> -> vector<8x8xf32>
    %cst_79 = arith.constant dense<0.000000e+00> : vector<8x8xf32>
    %99 = tpu.matmul %0, %98, %cst_79 {dimension_numbers = #tpu.dot_dimension_numbers<[1], [0], [0], [1], [0, 0, 1, 1], [], []>} : vector<8x8xf32>, vector<8x8xf32>, vector<8x8xf32> -> vector<8x8xf32>
    %cst_80 = arith.constant 0.000000e+00 : f32
    %100 = vector.broadcast %cst_80 : f32 to vector<8x8xf32>
    %101 = arith.subf %100, %80 : vector<8x8xf32>
    %102 = arith.addf %101, %96 : vector<8x8xf32>
    %103 = arith.addf %102, %97 : vector<8x8xf32>
    %104 = arith.subf %103, %99 : vector<8x8xf32>
    %c0_81 = arith.constant 0 : index
    %c0_82 = arith.constant 0 : index
    %c1_83 = arith.constant 1 : index
    %c0_84 = arith.constant 0 : index
    %c0_85 = arith.constant 0 : index
    %105 = vector.load %arg5[%c0_81, %c0_82, %c1_83, %c0_84, %c0_85] : memref<1x4x4x8x8xf32, #tpu.memory_space<vmem>>, vector<1x1x1x8x8xf32>
    %106 = vector.shape_cast %105 : vector<1x1x1x8x8xf32> to vector<8x8xf32>
    %107 = vector.shape_cast %104 : vector<8x8xf32> to vector<1x1x1x8x8xf32>
    tpu.vector_store %arg5[%c0_81, %c0_82, %c1_83, %c0_84, %c0_85], %107 {strides = array<i32>} : memref<1x4x4x8x8xf32, #tpu.memory_space<vmem>>, vector<1x1x1x8x8xf32>,
    %cst_86 = arith.constant 0.000000e+00 : f32
    %108 = vector.broadcast %cst_86 : f32 to vector<8x8xf32>
    %109 = arith.subf %108, %80 : vector<8x8xf32>
    %110 = arith.subf %109, %96 : vector<8x8xf32>
    %111 = arith.subf %110, %97 : vector<8x8xf32>
    %112 = arith.subf %111, %99 : vector<8x8xf32>
    %c0_87 = arith.constant 0 : index
    %c1_88 = arith.constant 1 : index
    %c1_89 = arith.constant 1 : index
    %c0_90 = arith.constant 0 : index
    %c0_91 = arith.constant 0 : index
    %113 = vector.load %arg5[%c0_87, %c1_88, %c1_89, %c0_90, %c0_91] : memref<1x4x4x8x8xf32, #tpu.memory_space<vmem>>, vector<1x1x1x8x8xf32>
    %114 = vector.shape_cast %113 : vector<1x1x1x8x8xf32> to vector<8x8xf32>
    %115 = vector.shape_cast %112 : vector<8x8xf32> to vector<1x1x1x8x8xf32>
    tpu.vector_store %arg5[%c0_87, %c1_88, %c1_89, %c0_90, %c0_91], %115 {strides = array<i32>} : memref<1x4x4x8x8xf32, #tpu.memory_space<vmem>>, vector<1x1x1x8x8xf32>,
    %cst_92 = arith.constant 0.000000e+00 : f32
    %116 = vector.broadcast %cst_92 : f32 to vector<8x8xf32>
    %117 = arith.subf %116, %80 : vector<8x8xf32>
    %118 = arith.subf %117, %96 : vector<8x8xf32>
    %119 = arith.addf %118, %97 : vector<8x8xf32>
    %120 = arith.addf %119, %99 : vector<8x8xf32>
    %c0_93 = arith.constant 0 : index
    %c2_94 = arith.constant 2 : index
    %c1_95 = arith.constant 1 : index
    %c0_96 = arith.constant 0 : index
    %c0_97 = arith.constant 0 : index
    %121 = vector.load %arg5[%c0_93, %c2_94, %c1_95, %c0_96, %c0_97] : memref<1x4x4x8x8xf32, #tpu.memory_space<vmem>>, vector<1x1x1x8x8xf32>
    %122 = vector.shape_cast %121 : vector<1x1x1x8x8xf32> to vector<8x8xf32>
    %123 = vector.shape_cast %120 : vector<8x8xf32> to vector<1x1x1x8x8xf32>
    tpu.vector_store %arg5[%c0_93, %c2_94, %c1_95, %c0_96, %c0_97], %123 {strides = array<i32>} : memref<1x4x4x8x8xf32, #tpu.memory_space<vmem>>, vector<1x1x1x8x8xf32>,
    %124 = arith.subf %80, %96 : vector<8x8xf32>
    %125 = arith.addf %124, %97 : vector<8x8xf32>
    %126 = arith.subf %125, %99 : vector<8x8xf32>
    %c0_98 = arith.constant 0 : index
    %c3_99 = arith.constant 3 : index
    %c1_100 = arith.constant 1 : index
    %c0_101 = arith.constant 0 : index
    %c0_102 = arith.constant 0 : index
    %127 = vector.load %arg5[%c0_98, %c3_99, %c1_100, %c0_101, %c0_102] : memref<1x4x4x8x8xf32, #tpu.memory_space<vmem>>, vector<1x1x1x8x8xf32>
    %128 = vector.shape_cast %127 : vector<1x1x1x8x8xf32> to vector<8x8xf32>
    %129 = vector.shape_cast %126 : vector<8x8xf32> to vector<1x1x1x8x8xf32>
    tpu.vector_store %arg5[%c0_98, %c3_99, %c1_100, %c0_101, %c0_102], %129 {strides = array<i32>} : memref<1x4x4x8x8xf32, #tpu.memory_space<vmem>>, vector<1x1x1x8x8xf32>,
    %c0_103 = arith.constant 0 : index
    %c0_104 = arith.constant 0 : index
    %c2_105 = arith.constant 2 : index
    %c0_106 = arith.constant 0 : index
    %c0_107 = arith.constant 0 : index
    %130 = vector.load %arg2[%c0_103, %c0_104, %c2_105, %c0_106, %c0_107] : memref<1x4x4x8x8xf32, #tpu.memory_space<vmem>>, vector<1x1x1x8x8xf32>
    %131 = vector.shape_cast %130 : vector<1x1x1x8x8xf32> to vector<8x8xf32>
    %c0_108 = arith.constant 0 : index
    %c1_109 = arith.constant 1 : index
    %c2_110 = arith.constant 2 : index
    %c0_111 = arith.constant 0 : index
    %c0_112 = arith.constant 0 : index
    %132 = vector.load %arg2[%c0_108, %c1_109, %c2_110, %c0_111, %c0_112] : memref<1x4x4x8x8xf32, #tpu.memory_space<vmem>>, vector<1x1x1x8x8xf32>
    %133 = vector.shape_cast %132 : vector<1x1x1x8x8xf32> to vector<8x8xf32>
    %c0_113 = arith.constant 0 : index
    %c2_114 = arith.constant 2 : index
    %c2_115 = arith.constant 2 : index
    %c0_116 = arith.constant 0 : index
    %c0_117 = arith.constant 0 : index
    %134 = vector.load %arg2[%c0_113, %c2_114, %c2_115, %c0_116, %c0_117] : memref<1x4x4x8x8xf32, #tpu.memory_space<vmem>>, vector<1x1x1x8x8xf32>
    %135 = vector.shape_cast %134 : vector<1x1x1x8x8xf32> to vector<8x8xf32>
    %c0_118 = arith.constant 0 : index
    %c3_119 = arith.constant 3 : index
    %c2_120 = arith.constant 2 : index
    %c0_121 = arith.constant 0 : index
    %c0_122 = arith.constant 0 : index
    %136 = vector.load %arg2[%c0_118, %c3_119, %c2_120, %c0_121, %c0_122] : memref<1x4x4x8x8xf32, #tpu.memory_space<vmem>>, vector<1x1x1x8x8xf32>
    %137 = vector.shape_cast %136 : vector<1x1x1x8x8xf32> to vector<8x8xf32>
    %cst_123 = arith.constant 0.000000e+00 : f32
    %138 = vector.broadcast %cst_123 : f32 to vector<8x8xf32>
    %139 = arith.subf %138, %131 : vector<8x8xf32>
    %140 = arith.subf %139, %133 : vector<8x8xf32>
    %141 = arith.subf %140, %135 : vector<8x8xf32>
    %142 = arith.addf %141, %137 : vector<8x8xf32>
    %cst_124 = arith.constant 5.000000e-01 : f32
    %143 = vector.broadcast %cst_124 : f32 to vector<8x8xf32>
    %144 = arith.mulf %143, %142 : vector<8x8xf32>
    %145 = arith.subf %131, %133 : vector<8x8xf32>
    %146 = arith.addf %145, %135 : vector<8x8xf32>
    %147 = arith.addf %146, %137 : vector<8x8xf32>
    %cst_125 = arith.constant 5.000000e-01 : f32
    %148 = vector.broadcast %cst_125 : f32 to vector<8x8xf32>
    %149 = arith.mulf %148, %147 : vector<8x8xf32>
    %150 = arith.addf %131, %133 : vector<8x8xf32>
    %151 = arith.subf %150, %135 : vector<8x8xf32>
    %152 = arith.addf %151, %137 : vector<8x8xf32>
    %cst_126 = arith.constant 5.000000e-01 : f32
    %153 = vector.broadcast %cst_126 : f32 to vector<8x8xf32>
    %154 = arith.mulf %153, %152 : vector<8x8xf32>
    %155 = arith.subf %131, %133 : vector<8x8xf32>
    %156 = arith.subf %155, %135 : vector<8x8xf32>
    %157 = arith.subf %156, %137 : vector<8x8xf32>
    %cst_127 = arith.constant 5.000000e-01 : f32
    %158 = vector.broadcast %cst_127 : f32 to vector<8x8xf32>
    %159 = arith.mulf %158, %157 : vector<8x8xf32>
    %cst_128 = arith.constant dense<0.000000e+00> : vector<8x8xf32>
    %160 = tpu.matmul %0, %149, %cst_128 {dimension_numbers = #tpu.dot_dimension_numbers<[1], [0], [0], [1], [0, 0, 1, 1], [], []>} : vector<8x8xf32>, vector<8x8xf32>, vector<8x8xf32> -> vector<8x8xf32>
    %cst_129 = arith.constant dense<0.000000e+00> : vector<8x8xf32>
    %161 = tpu.matmul %154, %1, %cst_129 {dimension_numbers = #tpu.dot_dimension_numbers<[1], [0], [0], [1], [0, 0, 1, 1], [], []>} : vector<8x8xf32>, vector<8x8xf32>, vector<8x8xf32> -> vector<8x8xf32>
    %cst_130 = arith.constant dense<0.000000e+00> : vector<8x8xf32>
    %162 = tpu.matmul %159, %1, %cst_130 {dimension_numbers = #tpu.dot_dimension_numbers<[1], [0], [0], [1], [0, 0, 1, 1], [], []>} : vector<8x8xf32>, vector<8x8xf32>, vector<8x8xf32> -> vector<8x8xf32>
    %cst_131 = arith.constant dense<0.000000e+00> : vector<8x8xf32>
    %163 = tpu.matmul %0, %162, %cst_131 {dimension_numbers = #tpu.dot_dimension_numbers<[1], [0], [0], [1], [0, 0, 1, 1], [], []>} : vector<8x8xf32>, vector<8x8xf32>, vector<8x8xf32> -> vector<8x8xf32>
    %cst_132 = arith.constant 0.000000e+00 : f32
    %164 = vector.broadcast %cst_132 : f32 to vector<8x8xf32>
    %165 = arith.subf %164, %144 : vector<8x8xf32>
    %166 = arith.addf %165, %160 : vector<8x8xf32>
    %167 = arith.addf %166, %161 : vector<8x8xf32>
    %168 = arith.subf %167, %163 : vector<8x8xf32>
    %c0_133 = arith.constant 0 : index
    %c0_134 = arith.constant 0 : index
    %c2_135 = arith.constant 2 : index
    %c0_136 = arith.constant 0 : index
    %c0_137 = arith.constant 0 : index
    %169 = vector.load %arg5[%c0_133, %c0_134, %c2_135, %c0_136, %c0_137] : memref<1x4x4x8x8xf32, #tpu.memory_space<vmem>>, vector<1x1x1x8x8xf32>
    %170 = vector.shape_cast %169 : vector<1x1x1x8x8xf32> to vector<8x8xf32>
    %171 = vector.shape_cast %168 : vector<8x8xf32> to vector<1x1x1x8x8xf32>
    tpu.vector_store %arg5[%c0_133, %c0_134, %c2_135, %c0_136, %c0_137], %171 {strides = array<i32>} : memref<1x4x4x8x8xf32, #tpu.memory_space<vmem>>, vector<1x1x1x8x8xf32>,
    %cst_138 = arith.constant 0.000000e+00 : f32
    %172 = vector.broadcast %cst_138 : f32 to vector<8x8xf32>
    %173 = arith.subf %172, %144 : vector<8x8xf32>
    %174 = arith.subf %173, %160 : vector<8x8xf32>
    %175 = arith.subf %174, %161 : vector<8x8xf32>
    %176 = arith.subf %175, %163 : vector<8x8xf32>
    %c0_139 = arith.constant 0 : index
    %c1_140 = arith.constant 1 : index
    %c2_141 = arith.constant 2 : index
    %c0_142 = arith.constant 0 : index
    %c0_143 = arith.constant 0 : index
    %177 = vector.load %arg5[%c0_139, %c1_140, %c2_141, %c0_142, %c0_143] : memref<1x4x4x8x8xf32, #tpu.memory_space<vmem>>, vector<1x1x1x8x8xf32>
    %178 = vector.shape_cast %177 : vector<1x1x1x8x8xf32> to vector<8x8xf32>
    %179 = vector.shape_cast %176 : vector<8x8xf32> to vector<1x1x1x8x8xf32>
    tpu.vector_store %arg5[%c0_139, %c1_140, %c2_141, %c0_142, %c0_143], %179 {strides = array<i32>} : memref<1x4x4x8x8xf32, #tpu.memory_space<vmem>>, vector<1x1x1x8x8xf32>,
    %cst_144 = arith.constant 0.000000e+00 : f32
    %180 = vector.broadcast %cst_144 : f32 to vector<8x8xf32>
    %181 = arith.subf %180, %144 : vector<8x8xf32>
    %182 = arith.subf %181, %160 : vector<8x8xf32>
    %183 = arith.addf %182, %161 : vector<8x8xf32>
    %184 = arith.addf %183, %163 : vector<8x8xf32>
    %c0_145 = arith.constant 0 : index
    %c2_146 = arith.constant 2 : index
    %c2_147 = arith.constant 2 : index
    %c0_148 = arith.constant 0 : index
    %c0_149 = arith.constant 0 : index
    %185 = vector.load %arg5[%c0_145, %c2_146, %c2_147, %c0_148, %c0_149] : memref<1x4x4x8x8xf32, #tpu.memory_space<vmem>>, vector<1x1x1x8x8xf32>
    %186 = vector.shape_cast %185 : vector<1x1x1x8x8xf32> to vector<8x8xf32>
    %187 = vector.shape_cast %184 : vector<8x8xf32> to vector<1x1x1x8x8xf32>
    tpu.vector_store %arg5[%c0_145, %c2_146, %c2_147, %c0_148, %c0_149], %187 {strides = array<i32>} : memref<1x4x4x8x8xf32, #tpu.memory_space<vmem>>, vector<1x1x1x8x8xf32>,
    %188 = arith.subf %144, %160 : vector<8x8xf32>
    %189 = arith.addf %188, %161 : vector<8x8xf32>
    %190 = arith.subf %189, %163 : vector<8x8xf32>
    %c0_150 = arith.constant 0 : index
    %c3_151 = arith.constant 3 : index
    %c2_152 = arith.constant 2 : index
    %c0_153 = arith.constant 0 : index
    %c0_154 = arith.constant 0 : index
    %191 = vector.load %arg5[%c0_150, %c3_151, %c2_152, %c0_153, %c0_154] : memref<1x4x4x8x8xf32, #tpu.memory_space<vmem>>, vector<1x1x1x8x8xf32>
    %192 = vector.shape_cast %191 : vector<1x1x1x8x8xf32> to vector<8x8xf32>
    %193 = vector.shape_cast %190 : vector<8x8xf32> to vector<1x1x1x8x8xf32>
    tpu.vector_store %arg5[%c0_150, %c3_151, %c2_152, %c0_153, %c0_154], %193 {strides = array<i32>} : memref<1x4x4x8x8xf32, #tpu.memory_space<vmem>>, vector<1x1x1x8x8xf32>,
    %c0_155 = arith.constant 0 : index
    %c0_156 = arith.constant 0 : index
    %c3_157 = arith.constant 3 : index
    %c0_158 = arith.constant 0 : index
    %c0_159 = arith.constant 0 : index
    %194 = vector.load %arg2[%c0_155, %c0_156, %c3_157, %c0_158, %c0_159] : memref<1x4x4x8x8xf32, #tpu.memory_space<vmem>>, vector<1x1x1x8x8xf32>
    %195 = vector.shape_cast %194 : vector<1x1x1x8x8xf32> to vector<8x8xf32>
    %c0_160 = arith.constant 0 : index
    %c1_161 = arith.constant 1 : index
    %c3_162 = arith.constant 3 : index
    %c0_163 = arith.constant 0 : index
    %c0_164 = arith.constant 0 : index
    %196 = vector.load %arg2[%c0_160, %c1_161, %c3_162, %c0_163, %c0_164] : memref<1x4x4x8x8xf32, #tpu.memory_space<vmem>>, vector<1x1x1x8x8xf32>
    %197 = vector.shape_cast %196 : vector<1x1x1x8x8xf32> to vector<8x8xf32>
    %c0_165 = arith.constant 0 : index
    %c2_166 = arith.constant 2 : index
    %c3_167 = arith.constant 3 : index
    %c0_168 = arith.constant 0 : index
    %c0_169 = arith.constant 0 : index
    %198 = vector.load %arg2[%c0_165, %c2_166, %c3_167, %c0_168, %c0_169] : memref<1x4x4x8x8xf32, #tpu.memory_space<vmem>>, vector<1x1x1x8x8xf32>
    %199 = vector.shape_cast %198 : vector<1x1x1x8x8xf32> to vector<8x8xf32>
    %c0_170 = arith.constant 0 : index
    %c3_171 = arith.constant 3 : index
    %c3_172 = arith.constant 3 : index
    %c0_173 = arith.constant 0 : index
    %c0_174 = arith.constant 0 : index
    %200 = vector.load %arg2[%c0_170, %c3_171, %c3_172, %c0_173, %c0_174] : memref<1x4x4x8x8xf32, #tpu.memory_space<vmem>>, vector<1x1x1x8x8xf32>
    %201 = vector.shape_cast %200 : vector<1x1x1x8x8xf32> to vector<8x8xf32>
    %cst_175 = arith.constant 0.000000e+00 : f32
    %202 = vector.broadcast %cst_175 : f32 to vector<8x8xf32>
    %203 = arith.subf %202, %195 : vector<8x8xf32>
    %204 = arith.subf %203, %197 : vector<8x8xf32>
    %205 = arith.subf %204, %199 : vector<8x8xf32>
    %206 = arith.addf %205, %201 : vector<8x8xf32>
    %cst_176 = arith.constant 5.000000e-01 : f32
    %207 = vector.broadcast %cst_176 : f32 to vector<8x8xf32>
    %208 = arith.mulf %207, %206 : vector<8x8xf32>
    %209 = arith.subf %195, %197 : vector<8x8xf32>
    %210 = arith.addf %209, %199 : vector<8x8xf32>
    %211 = arith.addf %210, %201 : vector<8x8xf32>
    %cst_177 = arith.constant 5.000000e-01 : f32
    %212 = vector.broadcast %cst_177 : f32 to vector<8x8xf32>
    %213 = arith.mulf %212, %211 : vector<8x8xf32>
    %214 = arith.addf %195, %197 : vector<8x8xf32>
    %215 = arith.subf %214, %199 : vector<8x8xf32>
    %216 = arith.addf %215, %201 : vector<8x8xf32>
    %cst_178 = arith.constant 5.000000e-01 : f32
    %217 = vector.broadcast %cst_178 : f32 to vector<8x8xf32>
    %218 = arith.mulf %217, %216 : vector<8x8xf32>
    %219 = arith.subf %195, %197 : vector<8x8xf32>
    %220 = arith.subf %219, %199 : vector<8x8xf32>
    %221 = arith.subf %220, %201 : vector<8x8xf32>
    %cst_179 = arith.constant 5.000000e-01 : f32
    %222 = vector.broadcast %cst_179 : f32 to vector<8x8xf32>
    %223 = arith.mulf %222, %221 : vector<8x8xf32>
    %cst_180 = arith.constant dense<0.000000e+00> : vector<8x8xf32>
    %224 = tpu.matmul %0, %213, %cst_180 {dimension_numbers = #tpu.dot_dimension_numbers<[1], [0], [0], [1], [0, 0, 1, 1], [], []>} : vector<8x8xf32>, vector<8x8xf32>, vector<8x8xf32> -> vector<8x8xf32>
    %cst_181 = arith.constant dense<0.000000e+00> : vector<8x8xf32>
    %225 = tpu.matmul %218, %1, %cst_181 {dimension_numbers = #tpu.dot_dimension_numbers<[1], [0], [0], [1], [0, 0, 1, 1], [], []>} : vector<8x8xf32>, vector<8x8xf32>, vector<8x8xf32> -> vector<8x8xf32>
    %cst_182 = arith.constant dense<0.000000e+00> : vector<8x8xf32>
    %226 = tpu.matmul %223, %1, %cst_182 {dimension_numbers = #tpu.dot_dimension_numbers<[1], [0], [0], [1], [0, 0, 1, 1], [], []>} : vector<8x8xf32>, vector<8x8xf32>, vector<8x8xf32> -> vector<8x8xf32>
    %cst_183 = arith.constant dense<0.000000e+00> : vector<8x8xf32>
    %227 = tpu.matmul %0, %226, %cst_183 {dimension_numbers = #tpu.dot_dimension_numbers<[1], [0], [0], [1], [0, 0, 1, 1], [], []>} : vector<8x8xf32>, vector<8x8xf32>, vector<8x8xf32> -> vector<8x8xf32>
    %cst_184 = arith.constant 0.000000e+00 : f32
    %228 = vector.broadcast %cst_184 : f32 to vector<8x8xf32>
    %229 = arith.subf %228, %208 : vector<8x8xf32>
    %230 = arith.addf %229, %224 : vector<8x8xf32>
    %231 = arith.addf %230, %225 : vector<8x8xf32>
    %232 = arith.subf %231, %227 : vector<8x8xf32>
    %c0_185 = arith.constant 0 : index
    %c0_186 = arith.constant 0 : index
    %c3_187 = arith.constant 3 : index
    %c0_188 = arith.constant 0 : index
    %c0_189 = arith.constant 0 : index
    %233 = vector.load %arg5[%c0_185, %c0_186, %c3_187, %c0_188, %c0_189] : memref<1x4x4x8x8xf32, #tpu.memory_space<vmem>>, vector<1x1x1x8x8xf32>
    %234 = vector.shape_cast %233 : vector<1x1x1x8x8xf32> to vector<8x8xf32>
    %235 = vector.shape_cast %232 : vector<8x8xf32> to vector<1x1x1x8x8xf32>
    tpu.vector_store %arg5[%c0_185, %c0_186, %c3_187, %c0_188, %c0_189], %235 {strides = array<i32>} : memref<1x4x4x8x8xf32, #tpu.memory_space<vmem>>, vector<1x1x1x8x8xf32>,
    %cst_190 = arith.constant 0.000000e+00 : f32
    %236 = vector.broadcast %cst_190 : f32 to vector<8x8xf32>
    %237 = arith.subf %236, %208 : vector<8x8xf32>
    %238 = arith.subf %237, %224 : vector<8x8xf32>
    %239 = arith.subf %238, %225 : vector<8x8xf32>
    %240 = arith.subf %239, %227 : vector<8x8xf32>
    %c0_191 = arith.constant 0 : index
    %c1_192 = arith.constant 1 : index
    %c3_193 = arith.constant 3 : index
    %c0_194 = arith.constant 0 : index
    %c0_195 = arith.constant 0 : index
    %241 = vector.load %arg5[%c0_191, %c1_192, %c3_193, %c0_194, %c0_195] : memref<1x4x4x8x8xf32, #tpu.memory_space<vmem>>, vector<1x1x1x8x8xf32>
    %242 = vector.shape_cast %241 : vector<1x1x1x8x8xf32> to vector<8x8xf32>
    %243 = vector.shape_cast %240 : vector<8x8xf32> to vector<1x1x1x8x8xf32>
    tpu.vector_store %arg5[%c0_191, %c1_192, %c3_193, %c0_194, %c0_195], %243 {strides = array<i32>} : memref<1x4x4x8x8xf32, #tpu.memory_space<vmem>>, vector<1x1x1x8x8xf32>,
    %cst_196 = arith.constant 0.000000e+00 : f32
    %244 = vector.broadcast %cst_196 : f32 to vector<8x8xf32>
    %245 = arith.subf %244, %208 : vector<8x8xf32>
    %246 = arith.subf %245, %224 : vector<8x8xf32>
    %247 = arith.addf %246, %225 : vector<8x8xf32>
    %248 = arith.addf %247, %227 : vector<8x8xf32>
    %c0_197 = arith.constant 0 : index
    %c2_198 = arith.constant 2 : index
    %c3_199 = arith.constant 3 : index
    %c0_200 = arith.constant 0 : index
    %c0_201 = arith.constant 0 : index
    %249 = vector.load %arg5[%c0_197, %c2_198, %c3_199, %c0_200, %c0_201] : memref<1x4x4x8x8xf32, #tpu.memory_space<vmem>>, vector<1x1x1x8x8xf32>
    %250 = vector.shape_cast %249 : vector<1x1x1x8x8xf32> to vector<8x8xf32>
    %251 = vector.shape_cast %248 : vector<8x8xf32> to vector<1x1x1x8x8xf32>
    tpu.vector_store %arg5[%c0_197, %c2_198, %c3_199, %c0_200, %c0_201], %251 {strides = array<i32>} : memref<1x4x4x8x8xf32, #tpu.memory_space<vmem>>, vector<1x1x1x8x8xf32>,
    %252 = arith.subf %208, %224 : vector<8x8xf32>
    %253 = arith.addf %252, %225 : vector<8x8xf32>
    %254 = arith.subf %253, %227 : vector<8x8xf32>
    %c0_202 = arith.constant 0 : index
    %c3_203 = arith.constant 3 : index
    %c3_204 = arith.constant 3 : index
    %c0_205 = arith.constant 0 : index
    %c0_206 = arith.constant 0 : index
    %255 = vector.load %arg5[%c0_202, %c3_203, %c3_204, %c0_205, %c0_206] : memref<1x4x4x8x8xf32, #tpu.memory_space<vmem>>, vector<1x1x1x8x8xf32>
    %256 = vector.shape_cast %255 : vector<1x1x1x8x8xf32> to vector<8x8xf32>
    %257 = vector.shape_cast %254 : vector<8x8xf32> to vector<1x1x1x8x8xf32>
    tpu.vector_store %arg5[%c0_202, %c3_203, %c3_204, %c0_205, %c0_206], %257 {strides = array<i32>} : memref<1x4x4x8x8xf32, #tpu.memory_space<vmem>>, vector<1x1x1x8x8xf32>,
    return
  }
  func.func @transform_0(%arg0: i32, %arg1: i32) -> (i32, i32, i32, i32, i32) {
    %c0_i32 = arith.constant 0 : i32
    %c0_i32_0 = arith.constant 0 : i32
    %c0_i32_1 = arith.constant 0 : i32
    %c0_i32_2 = arith.constant 0 : i32
    return %arg0, %c0_i32, %arg1, %c0_i32_0, %c0_i32_1 : i32, i32, i32, i32, i32
  }
  func.func @transform_1(%arg0: i32, %arg1: i32) -> (i32, i32) {
    %c0_i32 = arith.constant 0 : i32
    %c0_i32_0 = arith.constant 0 : i32
    %c0_i32_1 = arith.constant 0 : i32
    return %c0_i32, %c0_i32_0 : i32, i32
  }
  func.func @transform_2(%arg0: i32, %arg1: i32) -> (i32, i32) {
    %c0_i32 = arith.constant 0 : i32
    %c0_i32_0 = arith.constant 0 : i32
    %c0_i32_1 = arith.constant 0 : i32
    return %c0_i32, %c0_i32_0 : i32, i32
  }
  func.func @transform_3(%arg0: i32, %arg1: i32) -> (i32, i32, i32, i32, i32) {
    %c0_i32 = arith.constant 0 : i32
    %c0_i32_0 = arith.constant 0 : i32
    %c0_i32_1 = arith.constant 0 : i32
    %c0_i32_2 = arith.constant 0 : i32
    return %arg0, %c0_i32, %arg1, %c0_i32_0, %c0_i32_1 : i32, i32, i32, i32, i32
  }
}

</mosaic_0001>

<bundles_post_ra>
// kernel: nlwt_catone.1
= control target key start
LH: loop header
LB: loop body
LE: loop exit
PB: predicated region body
PF: predicated region fallthrough
CT: control target
= control target key end

     0   :  { %s1864_s12 = smov 0   ;;  %s1866_s13 = smov 0   ;;  %s2149_s0 = inlined_call_operand.vmem [shape: f32[2,4,4,8,8], index: 0, kind: input, shape index: {}]   ;;  %s2150_s1 = inlined_call_operand.vmem [shape: f32[8,8], index: 1, kind: input, shape index: {}]   ;;  %s2151_s2 = inlined_call_operand.vmem [shape: f32[8,8], index: 2, kind: input, shape index: {}]   ;;  %s2152_s3 = inlined_call_operand.vmem [shape: f32[2,4,4,8,8], index: 3, kind: output, shape index: {}]  }
   0x1   :  { %s1868_s14 = smov 0  }
   0x2 LB: > { %s25_s15 = sadd.s32 1, %s1836_s13  ;;  %p1625_p0 = scmp.ge.s32.totalorder %s1840_s14, 1  ;;  %s1840_s14 = sphi %s1868_s14, %s13_s14   ;;  %s1836_s13 = sphi %s1866_s13, %s2154_s13   ;;  %s1832_s12 = sphi %s1864_s12, %s2153_s12  }
   0x3   : > { %p27_p1 = scmp.ge.s32.totalorder %s25_s15, 2  ;;  %p158_p2 = scmp.lt.s32.totalorder %s1840_s14, 3 }
   0x5   : > { %s2156_s15 = smov (%p27_p1, %s25_s15), 0  ;;  %p159_p3 = pnand %p1625_p0, %p158_p2 }
   0x6   : > { %p191_p4 = scmp.lt.s32.totalorder (!%p159_p3), %s1832_s12, 1  ;;  %v1885_v0 = vld [vmem:[%s2151_s2] sm:$0xff] (!%p159_p3)  ;;  %v1842_v1 = vmov (!%p159_p3), 0.0   ;;  %vm1843_vm0 = vmmov (!%p159_p3), 0   ;;  %vm235_vm1 = vcmask (!%p159_p3), 64512  }
   0x7   : > { %162 = sbr.rel (%p159_p3) target bundleno = 485 (0x1e5), region = 32  ;;  %1712 = vmatprep.subr.mxu0 (!%p159_p3), %v1842_v1  ;;  %1714 = vmatprep.mubr.msk.f32.mxu0 (!%p159_p3), %vm1843_vm0, %v1842_v1  ;;  %v1933_v25 = vld [vmem:[%s2150_s1] sm:$0xff] (!%p159_p3) }
   0x8   : > { %1717 = vmatprep.subr.mxu1 (!%p159_p3), %v1842_v1  ;;  %1719 = vmatprep.mubr.msk.f32.mxu1 (!%p159_p3), %vm1843_vm0, %v1842_v1 }
   0x9   : > { %1718 = vmatpush3.msra.mxu1 (!%p159_p3), %v1885_v0 }
   0xa   : > { %1727 = vmatprep.subr.mxu1 (!%p159_p3), %v1842_v1 }
   0xe   : > { %s2158_s12 = smov (!%p191_p4, %s1832_s12), 1 }
   0xf   : > { %s1678_s18 = sshll.u32 %s2158_s12, 7 }
  0x10   : > { %s1903_s21 = scalar_lea.vmem %s2149_s0, %s1678_s18  ;;  %s2089_s26 = scalar_lea.vmem %s2152_s3, %s1678_s18 }
  0x11   : > { %v212_v2 = vld [vmem:[%s1903_s21] sm:$0xff]  ;;  %v1909_v8 = vld [vmem:[%s1903_s21 + $0x8] sm:$0xff]  ;;  %v1925_v19 = vld [vmem:[%s1903_s21 + $0x10] sm:$0xff] }
  0x12   : > { %v1630_v3 = vld [vmem:[%s1903_s21 + $0x20] sm:$0xff]  ;;  %v219_v5 = vsub.f32 0.0, %v212_v2  ;;  %v1912_v9 = vld [vmem:[%s1903_s21 + $0x28] sm:$0xff]  ;;  %v1928_v20 = vld [vmem:[%s1903_s21 + $0x30] sm:$0xff] }
  0x13   : > { %v1631_v4 = vld [vmem:[%s1903_s21 + $0x40] sm:$0xff]  ;;  %v224_v6 = vsub.f32 %v212_v2, %v1630_v3  ;;  %v228_v7 = vadd.f32 %v1630_v3, %v212_v2  ;;  %v1916_v11 = vld [vmem:[%s1903_s21 + $0x48] sm:$0xff]  ;;  %v557_v12 = vsub.f32 %v1909_v8, %v1912_v9  ;;  %v887_v28 = vsub.f32 %v1925_v19, %v1928_v20  ;;  %v1939_v29 = vld [vmem:[%s1903_s21 + $0x50] sm:$0xff] }
  0x14   : > { %v1632_v10 = vld [vmem:[%s1903_s21 + $0x60] sm:$0xff]  ;;  %v220_v16 = vsub.f32 %v219_v5, %v1630_v3  ;;  %v1921_v17 = vld [vmem:[%s1903_s21 + $0x68] sm:$0xff]  ;;  %v1952_v36 = vld [vmem:[%s1903_s21 + $0x70] sm:$0xff]  ;;  %v561_v56 = vadd.f32 %v1912_v9, %v1909_v8  ;;  %v891_v5 = vadd.f32 %v1928_v20, %v1925_v19 }
  0x15   : > { %v225_v13 = vadd.f32 %v1631_v4, %v224_v6  ;;  %v232_v14 = vsub.f32 %v224_v6, %v1631_v4  ;;  %v229_v15 = vsub.f32 %v228_v7, %v1631_v4  ;;  %v558_v18 = vadd.f32 %v1916_v11, %v557_v12  ;;  %v1955_v37 = vld [vmem:[%s1903_s21 + $0x18] sm:$0xff] }
  0x16   : > { %v221_v30 = vsub.f32 %v220_v16, %v1631_v4  ;;  %v565_v32 = vsub.f32 %v557_v12, %v1916_v11  ;;  %v888_v34 = vadd.f32 %v1939_v29, %v887_v28  ;;  %v1958_v38 = vld [vmem:[%s1903_s21 + $0x38] sm:$0xff]  ;;  %v895_v44 = vsub.f32 %v887_v28, %v1939_v29 }
  0x17   : > { %v226_v21 = vadd.f32 %v1632_v10, %v225_v13  ;;  %v230_v22 = vadd.f32 %v1632_v10, %v229_v15  ;;  %v233_v23 = vsub.f32 %v232_v14, %v1632_v10  ;;  %v559_v27 = vadd.f32 %v1921_v17, %v558_v18  ;;  %v1971_v42 = vld [vmem:[%s1903_s21 + $0x58] sm:$0xff] }
  0x18   : > { %v222_v35 = vadd.f32 %v1632_v10, %v221_v30  ;;  %v566_v39 = vsub.f32 %v565_v32, %v1921_v17  ;;  %v889_v40 = vadd.f32 %v1952_v36, %v888_v34  ;;  %v1217_v41 = vsub.f32 %v1955_v37, %v1958_v38  ;;  %v1982_v47 = vld [vmem:[%s1903_s21 + $0x78] sm:$0xff] }
  0x19   : > { %v227_v24 = vmul.f32 0.5, %v226_v21  ;;  %v231_v26 = vmul.f32 0.5, %v230_v22  ;;  %v234_v31 = vmul.f32 0.5, %v233_v23  ;;  %v560_v33 = vmul.f32 0.5, %v559_v27 }
  0x1a   : > { %v567_v43 = vmul.f32 0.5, %v566_v39  ;;  %v890_v45 = vmul.f32 0.5, %v889_v40  ;;  %v1218_v46 = vadd.f32 %v1971_v42, %v1217_v41  ;;  %v896_v48 = vsub.f32 %v895_v44, %v1952_v36 }
  0x1b   : > { %1713 = vmatpush3.msra.mxu0 %v227_v24  ;;  %1720 = vmatmul.mubr.msk.f32.vlgmr.msra.gmra.mrb[0].mxu1 %vm235_vm1, %v231_v26  ;;  %v1225_v51 = vsub.f32 %v1217_v41, %v1971_v42  ;;  %v223_v55 = vmul.f32 0.5, %v222_v35  ;;  %v562_v58 = vsub.f32 %v561_v56, %v1916_v11  ;;  %v892_v16 = vsub.f32 %v891_v5, %v1939_v29 }
  0x1c   : > { %1715 = vmatmul.mubr.msk.f32.vlgmr.msra.gmra.mrb[0].mxu0 %vm235_vm1, %v1933_v25  ;;  %1722 = vmatprep.subr.mxu0 %v1842_v1  ;;  %v1219_v49 = vadd.f32 %v1982_v47, %v1218_v46  ;;  %v897_v50 = vmul.f32 0.5, %v896_v48  ;;  %v1221_v23 = vadd.f32 %v1958_v38, %v1955_v37 }
  0x1d   : > { %1723 = vmatpush3.msra.mxu0 %v1885_v0  ;;  %1724 = vmatprep.mubr.msk.f32.mxu0 %vm1843_vm0, %v1842_v1  ;;  %v1226_v53 = vsub.f32 %v1225_v51, %v1982_v47  ;;  %v525_v57 = vsub.f32 0.0, %v223_v55  ;;  %v563_v4 = vadd.f32 %v1921_v17, %v562_v58  ;;  %v893_v22 = vadd.f32 %v1952_v36, %v892_v16 }
  0x1e   : > { %1732 = vmatprep.subr.mxu0 %v1842_v1  ;;  %1729 = vmatprep.mubr.msk.f32.mxu1 %vm1843_vm0, %v1842_v1  ;;  %v1220_v52 = vmul.f32 0.5, %v1219_v49  ;;  %v1222_v28 = vsub.f32 %v1221_v23, %v1971_v42  ;;  %v1212_v51 = vsub.f32 0.0, %v1955_v37 }
  0x1f   : > { %v1227_v54 = vmul.f32 0.5, %v1226_v53  ;;  %v564_v15 = vmul.f32 0.5, %v563_v4  ;;  %v894_v27 = vmul.f32 0.5, %v893_v22 }
  0x20   : > { %1725 = vmatmul.mubr.msk.f32.vlgmr.msra.gmra.mrb[2].mxu0 %vm235_vm1, %v234_v31  ;;  %v1223_v32 = vadd.f32 %v1982_v47, %v1222_v28 }
  0x21   : > { %1733 = vmatpush3.msra.mxu0 %v560_v33  ;;  %1734 = vmatprep.mubr.msk.f32.mxu0 %vm1843_vm0, %v1842_v1 }
  0x22   : > { %1742 = vmatprep.subr.mxu0 %v1842_v1  ;;  %v1224_v35 = vmul.f32 0.5, %v1223_v32 }
  0x24   : > { %1735 = vmatmul.mubr.msk.f32.vlgmr.msra.gmra.mrb[4].mxu0 %vm235_vm1, %v1933_v25 }
  0x25   : > { %1743 = vmatpush3.msra.mxu0 %v1885_v0  ;;  %1744 = vmatprep.mubr.msk.f32.mxu0 %vm1843_vm0, %v1842_v1 }
  0x26   : > { %1752 = vmatprep.subr.mxu0 %v1842_v1 }
  0x28   : > { %1745 = vmatmul.mubr.msk.f32.vlgmr.msra.gmra.mrb[6].mxu0 %vm235_vm1, %v567_v43 }
  0x29   : > { %1753 = vmatpush3.msra.mxu0 %v890_v45  ;;  %1754 = vmatprep.mubr.msk.f32.mxu0 %vm1843_vm0, %v1842_v1  ;;  %v882_v45 = vsub.f32 0.0, %v1925_v19 }
  0x2a   : > { %1762 = vmatprep.subr.mxu0 %v1842_v1 }
  0x2b   : > { %v883_v48 = vsub.f32 %v882_v45, %v1928_v20 }
  0x2c   : > { %1755 = vmatmul.mubr.msk.f32.vlgmr.msra.gmra.mrb[8].mxu0 %vm235_vm1, %v1933_v25 }
  0x2d   : > { %1763 = vmatpush3.msra.mxu0 %v1885_v0  ;;  %1764 = vmatprep.mubr.msk.f32.mxu0 %vm1843_vm0, %v1842_v1 }
  0x2e   : > { %1772 = vmatprep.subr.mxu0 %v1842_v1 }
  0x30   : > { %1765 = vmatmul.mubr.msk.f32.vlgmr.msra.gmra.mrb[10].mxu0 %vm235_vm1, %v897_v50 }
  0x31   : > { %1773 = vmatpush3.msra.mxu0 %v1220_v52  ;;  %1774 = vmatprep.mubr.msk.f32.mxu0 %vm1843_vm0, %v1842_v1 }
  0x32   : > { %1782 = vmatprep.subr.mxu0 %v1842_v1 }
  0x34   : > { %1775 = vmatmul.mubr.msk.f32.vlgmr.msra.gmra.mrb[12].mxu0 %vm235_vm1, %v1933_v25 }
  0x35   : > { %1783 = vmatpush3.msra.mxu0 %v1885_v0  ;;  %1784 = vmatprep.mubr.msk.f32.mxu0 %vm1843_vm0, %v1842_v1 }
  0x38   : > { %1785 = vmatmul.mubr.msk.f32.vlgmr.msra.gmra.mrb[14].mxu0 %vm235_vm1, %v1227_v54 }
  0xee   : > { %v2011_v59 = vpop.f32.mrb[0].mxu1 }
  0xef   : > { %v305_v60 = vpop.f32.mrb[0].mxu0  ;;  %v1721_v61 = vpop.f32.mrb[1].mxu1 }
  0xf0   : > { %v526_v62 = vadd.f32 %v525_v57, %v305_v60  ;;  %v2013_v63 = vsub.f32 %v525_v57, %v305_v60  ;;  %v539_v2 = vsub.f32 %v223_v55, %v305_v60  ;;  %v1716_v3 = vpop.f32.mrb[1].mxu0 }
  0xf2   : > { %v2019_v6 = vadd.f32 %v526_v62, %v2011_v59  ;;  %v531_v7 = vsub.f32 %v2013_v63, %v2011_v59  ;;  %v2025_v10 = vadd.f32 %v2013_v63, %v2011_v59  ;;  %v2028_v12 = vadd.f32 %v539_v2, %v2011_v59 }
  0xf3   : > { %v451_v13 = vpop.f32.mrb[2].mxu0 }
  0xf4   : > { %v1726_v14 = vpop.f32.mrb[3].mxu0  ;;  %1728 = vmatpush3.msra.mxu1 %v451_v13 }
  0xf5   : > { %1730 = vmatmul.mubr.msk.f32.vlgmr.msra.gmra.mrb[2].mxu1 %vm235_vm1, %v1933_v25  ;;  %1737 = vmatprep.subr.mxu1 %v1842_v1 }
  0xf6   : > { %1738 = vmatpush3.msra.mxu1 %v1885_v0  ;;  %1739 = vmatprep.mubr.msk.f32.mxu1 %vm1843_vm0, %v1842_v1 }
  0xf7   : > { %v2037_v18 = vpop.f32.mrb[4].mxu0  ;;  %1747 = vmatprep.subr.mxu1 %v1842_v1 }
  0xf8   : > { %v1736_v21 = vpop.f32.mrb[5].mxu0 }
  0xf9   : > { %1740 = vmatmul.mubr.msk.f32.vlgmr.msra.gmra.mrb[4].mxu1 %vm235_vm1, %v564_v15 }
  0xfa   : > { %1749 = vmatprep.mubr.msk.f32.mxu1 %vm1843_vm0, %v1842_v1 }
  0xfb   : > { %v780_v24 = vpop.f32.mrb[6].mxu0 }
  0xfc   : > { %v1746_v26 = vpop.f32.mrb[7].mxu0  ;;  %1748 = vmatpush3.msra.mxu1 %v780_v24 }
  0xfd   : > { %1750 = vmatmul.mubr.msk.f32.vlgmr.msra.gmra.mrb[6].mxu1 %vm235_vm1, %v1933_v25  ;;  %1757 = vmatprep.subr.mxu1 %v1842_v1 }
  0xfe   : > { %1758 = vmatpush3.msra.mxu1 %v1885_v0  ;;  %1759 = vmatprep.mubr.msk.f32.mxu1 %vm1843_vm0, %v1842_v1 }
  0xff   : > { %v2053_v30 = vpop.f32.mrb[8].mxu0  ;;  %1767 = vmatprep.subr.mxu1 %v1842_v1 }
 0x100   : > { %v1756_v31 = vpop.f32.mrb[9].mxu0 }
 0x101   : > { %1760 = vmatmul.mubr.msk.f32.vlgmr.msra.gmra.mrb[8].mxu1 %vm235_vm1, %v894_v27 }
 0x102   : > { %1769 = vmatprep.mubr.msk.f32.mxu1 %vm1843_vm0, %v1842_v1 }
 0x103   : > { %v1110_v33 = vpop.f32.mrb[10].mxu0 }
 0x104   : > { %v1766_v34 = vpop.f32.mrb[11].mxu0  ;;  %1768 = vmatpush3.msra.mxu1 %v1110_v33 }
 0x105   : > { %1770 = vmatmul.mubr.msk.f32.vlgmr.msra.gmra.mrb[10].mxu1 %vm235_vm1, %v1933_v25  ;;  %1777 = vmatprep.subr.mxu1 %v1842_v1 }
 0x106   : > { %1778 = vmatpush3.msra.mxu1 %v1885_v0  ;;  %1779 = vmatprep.mubr.msk.f32.mxu1 %vm1843_vm0, %v1842_v1  ;;  %v552_v0 = vsub.f32 0.0, %v1909_v8  ;;  %v1213_v8 = vsub.f32 %v1212_v51, %v1958_v38 }
 0x107   : > { %v2066_v39 = vpop.f32.mrb[12].mxu0  ;;  %1787 = vmatprep.subr.mxu1 %v1842_v1 }
 0x108   : > { %v1776_v40 = vpop.f32.mrb[13].mxu0  ;;  %v553_v44 = vsub.f32 %v552_v0, %v1912_v9  ;;  %v1214_v54 = vsub.f32 %v1213_v8, %v1971_v42 }
 0x109   : > { %1780 = vmatmul.mubr.msk.f32.vlgmr.msra.gmra.mrb[12].mxu1 %vm235_vm1, %v1224_v35 }
 0x10a   : > { %1789 = vmatprep.mubr.msk.f32.mxu1 %vm1843_vm0, %v1842_v1  ;;  %v554_v46 = vsub.f32 %v553_v44, %v1916_v11  ;;  %v884_v1 = vsub.f32 %v883_v48, %v1939_v29  ;;  %v1215_v42 = vadd.f32 %v1982_v47, %v1214_v54 }
 0x10b   : > { %v1440_v41 = vpop.f32.mrb[14].mxu0 }
 0x10c   : > { %v1786_v43 = vpop.f32.mrb[15].mxu0  ;;  %1788 = vmatpush3.msra.mxu1 %v1440_v41  ;;  %v555_v49 = vadd.f32 %v1921_v17, %v554_v46  ;;  %v885_v52 = vadd.f32 %v1952_v36, %v884_v1 }
 0x10d   : > { %1790 = vmatmul.mubr.msk.f32.vlgmr.msra.gmra.mrb[14].mxu1 %vm235_vm1, %v1933_v25 }
 0x10e   : > { %v556_v50 = vmul.f32 0.5, %v555_v49  ;;  %v886_v36 = vmul.f32 0.5, %v885_v52 }
 0x110   : > { %v854_v25 = vsub.f32 0.0, %v556_v50  ;;  %v869_v53 = vsub.f32 %v556_v50, %v2037_v18  ;;  %v1184_v61 = vsub.f32 0.0, %v886_v36 }
 0x112   : > { %v855_v37 = vadd.f32 %v854_v25, %v2037_v18  ;;  %v860_v38 = vsub.f32 %v854_v25, %v2037_v18 }
 0x1c8   : > { %v521_v9 = vpop.f32.mrb[2].mxu1 }
 0x1c9   : > { %v528_v11 = vsub.f32 %v2019_v6, %v521_v9  ;;  %v532_v17 = vsub.f32 %v531_v7, %v521_v9  ;;  %v536_v19 = vadd.f32 %v2025_v10, %v521_v9  ;;  %v541_v20 = vsub.f32 %v2028_v12, %v521_v9  ;;  %v1731_v29 = vpop.f32.mrb[3].mxu1 }
 0x1ca   : > { %v1185_v6 = vadd.f32 %v1184_v61, %v2053_v30  ;;  %v1190_v7 = vsub.f32 %v1184_v61, %v2053_v30  ;;  %v1199_v10 = vsub.f32 %v886_v36, %v2053_v30  ;;  %v1216_v12 = vmul.f32 0.5, %v1215_v42 }
 0x1cb   : > { %529 = vst.msk [vmem:[%s2089_s26] sm:$0xff] %vm235_vm1, %v528_v11  ;;  %1637 = vst.msk [vmem:[%s2089_s26 + $0x20] sm:$0xff] %vm235_vm1, %v532_v17 }
 0x1cc   : > { %1638 = vst.msk [vmem:[%s2089_s26 + $0x40] sm:$0xff] %vm235_vm1, %v536_v19  ;;  %1639 = vst.msk [vmem:[%s2089_s26 + $0x60] sm:$0xff] %vm235_vm1, %v541_v20  ;;  %v707_v55 = vpop.f32.mrb[4].mxu1  ;;  %v1514_v21 = vsub.f32 0.0, %v1216_v12  ;;  %v1529_v32 = vsub.f32 %v1216_v12, %v2066_v39 }
 0x1cd   : > { %v856_v56 = vadd.f32 %v855_v37, %v707_v55  ;;  %v861_v57 = vsub.f32 %v860_v38, %v707_v55  ;;  %v865_v58 = vadd.f32 %v860_v38, %v707_v55  ;;  %v870_v59 = vadd.f32 %v869_v53, %v707_v55  ;;  %v1741_v60 = vpop.f32.mrb[5].mxu1 }
 0x1ce   : > { %v1515_v30 = vadd.f32 %v1514_v21, %v2066_v39  ;;  %v1520_v31 = vsub.f32 %v1514_v21, %v2066_v39 }
 0x1d0   : > { %v850_v62 = vpop.f32.mrb[6].mxu1 }
 0x1d1   : > { %v857_v63 = vsub.f32 %v856_v56, %v850_v62  ;;  %v862_v2 = vsub.f32 %v861_v57, %v850_v62  ;;  %v866_v3 = vadd.f32 %v865_v58, %v850_v62  ;;  %v871_v4 = vsub.f32 %v870_v59, %v850_v62  ;;  %v1751_v5 = vpop.f32.mrb[7].mxu1 }
 0x1d3   : > { %1648 = vst.msk [vmem:[%s2089_s26 + $0x8] sm:$0xff] %vm235_vm1, %v857_v63  ;;  %1649 = vst.msk [vmem:[%s2089_s26 + $0x28] sm:$0xff] %vm235_vm1, %v862_v2 }
 0x1d4   : > { %1650 = vst.msk [vmem:[%s2089_s26 + $0x48] sm:$0xff] %vm235_vm1, %v866_v3  ;;  %1651 = vst.msk [vmem:[%s2089_s26 + $0x68] sm:$0xff] %vm235_vm1, %v871_v4  ;;  %v1037_v47 = vpop.f32.mrb[8].mxu1 }
 0x1d5   : > { %v1186_v13 = vadd.f32 %v1185_v6, %v1037_v47  ;;  %v1191_v14 = vsub.f32 %v1190_v7, %v1037_v47  ;;  %v1195_v15 = vadd.f32 %v1190_v7, %v1037_v47  ;;  %v1200_v16 = vadd.f32 %v1199_v10, %v1037_v47  ;;  %v1761_v18 = vpop.f32.mrb[9].mxu1 }
 0x1d8   : > { %v1180_v22 = vpop.f32.mrb[10].mxu1 }
 0x1d9   : > { %v1187_v23 = vsub.f32 %v1186_v13, %v1180_v22  ;;  %v1192_v24 = vsub.f32 %v1191_v14, %v1180_v22  ;;  %v1196_v26 = vadd.f32 %v1195_v15, %v1180_v22  ;;  %v1201_v27 = vsub.f32 %v1200_v16, %v1180_v22  ;;  %v1771_v28 = vpop.f32.mrb[11].mxu1 }
 0x1db   : > { %1660 = vst.msk [vmem:[%s2089_s26 + $0x10] sm:$0xff] %vm235_vm1, %v1187_v23  ;;  %1661 = vst.msk [vmem:[%s2089_s26 + $0x30] sm:$0xff] %vm235_vm1, %v1192_v24 }
 0x1dc   : > { %1662 = vst.msk [vmem:[%s2089_s26 + $0x50] sm:$0xff] %vm235_vm1, %v1196_v26  ;;  %1663 = vst.msk [vmem:[%s2089_s26 + $0x70] sm:$0xff] %vm235_vm1, %v1201_v27  ;;  %v1367_v33 = vpop.f32.mrb[12].mxu1 }
 0x1dd   : > { %v1516_v34 = vadd.f32 %v1515_v30, %v1367_v33  ;;  %v1521_v35 = vsub.f32 %v1520_v31, %v1367_v33  ;;  %v1525_v40 = vadd.f32 %v1520_v31, %v1367_v33  ;;  %v1530_v41 = vadd.f32 %v1529_v32, %v1367_v33  ;;  %v1781_v43 = vpop.f32.mrb[13].mxu1 }
 0x1e0   : > { %v1510_v0 = vpop.f32.mrb[14].mxu1 }
 0x1e1   : > { %v1517_v39 = vsub.f32 %v1516_v34, %v1510_v0  ;;  %v1522_v44 = vsub.f32 %v1521_v35, %v1510_v0  ;;  %v1526_v45 = vadd.f32 %v1525_v40, %v1510_v0  ;;  %v1531_v46 = vsub.f32 %v1530_v41, %v1510_v0  ;;  %v1791_v48 = vpop.f32.mrb[15].mxu1 }
 0x1e3   : > { %1672 = vst.msk [vmem:[%s2089_s26 + $0x18] sm:$0xff] %vm235_vm1, %v1517_v39  ;;  %1673 = vst.msk [vmem:[%s2089_s26 + $0x38] sm:$0xff] %vm235_vm1, %v1522_v44 }
 0x1e4   : > { %1674 = vst.msk [vmem:[%s2089_s26 + $0x58] sm:$0xff] %vm235_vm1, %v1526_v45  ;;  %1675 = vst.msk [vmem:[%s2089_s26 + $0x78] sm:$0xff] %vm235_vm1, %v1531_v46 }
 0x1e5 PF: > { %s13_s14 = sadd.s32 1, %s1840_s14   ;;  %s2153_s12 = smov %s1836_s13 }
 0x1e6   : > { %p10_p5 = scmp.ge.s32.totalorder %s13_s14, 4   ;;  %s2154_s13 = smov %s2156_s15 }
 0x1e8   :  { %12 = sbr.rel (!%p10_p5) target bundleno = 2 (0x2), region = 92 }

</bundles_post_ra>
